<compile_context>
chip_gen: v7x
topology: tpu7x:2x2x1
jax: 0.10.0
libtpu: 0.0.40
codegen_flags: <defaults>
</compile_context>

<pallas_src>
import math

import jax
import jax.numpy as jnp
from jax.experimental import pallas as pl
from jax.experimental.pallas import tpu as pltpu


def _choose_layout(B, S, D, itemsize, block_bytes):
    """Fold (S, D) -> (R, L) and pick row/batch tile sizes (TR, TB)."""
    F = S * D
    if F % 128 == 0:
        cands = [l for l in range(min(1024, F), 127, -128) if F % l == 0]
        # Largest lane-dense L that still leaves R >= 8 rows (sublane-dense);
        # otherwise just the largest lane-dense L.
        L = next((l for l in cands if F // l >= 8), cands[0])
    else:
        L = D                      # natural-layout fallback
    R = F // L

    slab_bytes = F * itemsize      # one batch element's worth of data
    row_bytes = L * itemsize
    if slab_bytes <= block_bytes:
        # Whole slab fits one tile: block over several batch rows per step.
        TR = R
        TB = max(1, min(B, block_bytes // max(slab_bytes, 1)))
    else:
        TB = 1
        target_rows = max(1, block_bytes // row_bytes)
        TR = min(R, max(8, (target_rows // 8) * 8))   # multiple of 8 or full R
    return F, L, R, TR, TB


def _add_pe_kernel(x_ref, pe_ref, o_ref):
    # Pure streaming elementwise add; pe block (TR, L) broadcasts over the TB
    # batch rows of the x block (TB, TR, L).
    o_ref[...] = x_ref[...] + pe_ref[...]


class PositionalEncoding:
    """JAX/Pallas port of the PyTorch PositionalEncoding module."""

    def __init__(self, d_model, max_len=5000, dtype=jnp.float32,
                 block_bytes=4 << 20, donate_x=False):
        # Deterministic buffer init, identical to the PyTorch __init__
        # (glue, not the hot path).
        position = jnp.arange(max_len, dtype=jnp.float32)[:, None]
        div_term = jnp.exp(jnp.arange(0, d_model, 2, dtype=jnp.float32)
                           * (-math.log(10000.0) / d_model))
        angles = position * div_term
        pe = jnp.zeros((max_len, d_model), dtype=jnp.float32)
        pe = pe.at[:, 0::2].set(jnp.sin(angles))
        cos = jnp.cos(angles)
        pe = pe.at[:, 1::2].set(cos[:, : d_model // 2] if d_model % 2 else cos)

        self.d_model = d_model
        self.max_len = max_len
        self.block_bytes = int(block_bytes)
        self.donate_x = donate_x
        # Stored once in the compute dtype so the hot path never re-casts it.
        self.pe = pe.astype(dtype)                 # (max_len, d_model)
        self._pe_views = {}                        # (S, R, L, dtype) -> (R, L) prefix

    def _pe_view(self, S, R, L, dtype):
        key = (S, R, L, jnp.dtype(dtype).name)
        v = self._pe_views.get(key)
        if v is None:
            # Row-major prefix of pe == pe[:, :S] flattened; computed once per
            # sequence length and cached (hoisted off the per-call hot path).
            v = self.pe[:S].astype(dtype).reshape(R, L)
            self._pe_views[key] = v
        return v

    def __call__(self, x):
        B, S, D = x.shape
        if D != self.d_model:
            raise ValueError(f"d_model mismatch: got {D}, expected {self.d_model}")
        if S > self.max_len:
            raise ValueError(f"sequence length {S} exceeds max_len {self.max_len}")

        itemsize = jnp.dtype(x.dtype).itemsize
        F, L, R, TR, TB = _choose_layout(B, S, D, itemsize, self.block_bytes)
        pe_2d = self._pe_view(S, R, L, x.dtype)    # (R, L), cached
        x_3d = x.reshape(B, R, L)                  # contiguous row-major refold

        grid_r = pl.cdiv(R, TR)
        grid_b = pl.cdiv(B, TB)
        # Shard the long row-tile axis across v7x's 2 cores; keep a tiny/odd
        # batch axis "arbitrary" unless it is the only axis with work.
        dim_sem = ("parallel", "arbitrary") if grid_r > 1 else ("arbitrary", "parallel")

        # Double-buffered VMEM footprint: x + out blocks (TB,TR,L), pe (TR,L).
        blk = TR * L * itemsize
        vmem_est = 2 * (2 * TB * blk + blk)
        vmem_limit = int(min(56 << 20, max(3 * vmem_est // 2, 32 << 20)))

        extra = {}
        if self.donate_x:
            # Only a win when the caller actually donates x at the jit boundary;
            # otherwise XLA inserts a defensive copy.
            extra["input_output_aliases"] = {0: 0}

        out_3d = pl.pallas_call(
            _add_pe_kernel,
            out_shape=jax.ShapeDtypeStruct((B, R, L), x.dtype),
            grid_spec=pltpu.PrefetchScalarGridSpec(
                num_scalar_prefetch=0,
                grid=(grid_r, grid_b),                             # batch innermost
                in_specs=[
                    pl.BlockSpec((TB, TR, L), lambda r, b: (b, r, 0)),   # x
                    pl.BlockSpec((TR, L), lambda r, b: (r, 0)),          # pe: resident across b
                ],
                out_specs=pl.BlockSpec((TB, TR, L), lambda r, b: (b, r, 0)),
            ),
            compiler_params=pltpu.CompilerParams(
                dimension_semantics=dim_sem,
                vmem_limit_bytes=vmem_limit,
            ),
            cost_estimate=pl.CostEstimate(
                flops=B * F,
                transcendentals=0,
                bytes_accessed=(2 * B * F + F) * itemsize,
            ),
            **extra,
        )(x_3d, pe_2d)

        return out_3d.reshape(B, S, D)


if __name__ == "__main__":
    key = jax.random.PRNGKey(0)
    k0, k1, k2, k3, k4 = jax.random.split(key, 5)

    # Primary check: shapes implied by the module (batch=2, seq=8, d_model=32),
    # module-default max_len=5000.  Whole problem fits one batch-blocked tile.
    mod = PositionalEncoding(d_model=32, max_len=5000)
    x = jax.random.normal(k0, (2, 8, 32), dtype=jnp.float32)
    out = jax.block_until_ready(mod(x))
    ref = x + mod.pe[None, :8, :]
    assert out.shape == (2, 8, 32)
    assert jnp.allclose(out, ref, atol=1e-6, rtol=1e-6), "mismatch (primary)"

    # Multi-row-tile path with ragged last row tile and pe residency across
    # batch: F = 40*48 = 1920 -> (R, L) = (15, 128); tiny budget -> TR=8, grid (2, 3).
    mod2 = PositionalEncoding(d_model=48, max_len=128, block_bytes=4096)
    x2 = jax.random.normal(k1, (3, 40, 48), dtype=jnp.float32)
    out2 = jax.block_until_ready(mod2(x2))
    ref2 = x2 + mod2.pe[None, :40, :]
    assert jnp.allclose(out2, ref2, atol=1e-6, rtol=1e-6), "mismatch (row-tiled)"

    # Batch-blocked path with ragged batch (TB=2 over B=3).
    mod3 = PositionalEncoding(d_model=32, max_len=64, block_bytes=2048)
    x3 = jax.random.normal(k2, (3, 8, 32), dtype=jnp.float32)
    out3 = jax.block_until_ready(mod3(x3))
    ref3 = x3 + mod3.pe[None, :8, :]
    assert jnp.allclose(out3, ref3, atol=1e-6, rtol=1e-6), "mismatch (batch-blocked)"

    # F not a multiple of 128 -> natural-layout fallback.
    mod4 = PositionalEncoding(d_model=30, max_len=64)
    x4 = jax.random.normal(k3, (2, 5, 30), dtype=jnp.float32)
    out4 = jax.block_until_ready(mod4(x4))
    ref4 = x4 + mod4.pe[None, :5, :]
    assert jnp.allclose(out4, ref4, atol=1e-6, rtol=1e-6), "mismatch (fallback layout)"

    # bf16 compute dtype (pe stored in bf16 at init; add runs in bf16).
    mod5 = PositionalEncoding(d_model=32, max_len=64, dtype=jnp.bfloat16)
    x5 = jax.random.normal(k4, (2, 8, 32), dtype=jnp.bfloat16)
    out5 = jax.block_until_ready(mod5(x5))
    ref5 = x5 + mod5.pe[None, :8, :]
    assert jnp.allclose(out5.astype(jnp.float32),
                        ref5.astype(jnp.float32)), "mismatch (bf16)"

    print("KERNEL_OK")
</pallas_src>

<mosaic_0001>
module attributes {stable_mosaic.version = 11 : i64} {
  func.func @_add_pe_kernel(%arg0: i32, %arg1: i32, %arg2: memref<2x1x256xf32, #tpu.memory_space<vmem>>, %arg3: memref<1x256xf32, #tpu.memory_space<vmem>>, %arg4: memref<2x1x256xf32, #tpu.memory_space<vmem>>) attributes {dimension_semantics = [#tpu.dimension_semantics<arbitrary>, #tpu.dimension_semantics<parallel>], iteration_bounds = array<i64: 1, 1>, scalar_prefetch = 0 : i64, scratch_operands = 0 : i64, tpu.core_type = #tpu.core_type<tc>, window_params = [{transform_indices = @transform_0, window_bounds = array<i64: 2, 1, 256>}, {transform_indices = @transform_1, window_bounds = array<i64: 1, 256>}, {transform_indices = @transform_2, window_bounds = array<i64: 2, 1, 256>}]} {
    %c0 = arith.constant 0 : index
    %c0_0 = arith.constant 0 : index
    %c0_1 = arith.constant 0 : index
    %0 = vector.load %arg2[%c0, %c0_0, %c0_1] : memref<2x1x256xf32, #tpu.memory_space<vmem>>, vector<2x1x256xf32>
    %c0_2 = arith.constant 0 : index
    %c0_3 = arith.constant 0 : index
    %1 = vector.load %arg3[%c0_2, %c0_3] : memref<1x256xf32, #tpu.memory_space<vmem>>, vector<1x256xf32>
    %2 = vector.shape_cast %1 : vector<1x256xf32> to vector<1x1x256xf32>
    %3 = vector.broadcast %2 : vector<1x1x256xf32> to vector<2x1x256xf32>
    %4 = arith.addf %0, %3 : vector<2x1x256xf32>
    %c0_4 = arith.constant 0 : index
    %c0_5 = arith.constant 0 : index
    %c0_6 = arith.constant 0 : index
    %5 = vector.load %arg4[%c0_4, %c0_5, %c0_6] : memref<2x1x256xf32, #tpu.memory_space<vmem>>, vector<2x1x256xf32>
    tpu.vector_store %arg4[%c0_4, %c0_5, %c0_6], %4 {strides = array<i32>} : memref<2x1x256xf32, #tpu.memory_space<vmem>>, vector<2x1x256xf32>,
    return
  }
  func.func @transform_0(%arg0: i32, %arg1: i32) -> (i32, i32, i32) {
    %c0_i32 = arith.constant 0 : i32
    %c0_i32_0 = arith.constant 0 : i32
    return %arg1, %arg0, %c0_i32 : i32, i32, i32
  }
  func.func @transform_1(%arg0: i32, %arg1: i32) -> (i32, i32) {
    %c0_i32 = arith.constant 0 : i32
    %c0_i32_0 = arith.constant 0 : i32
    return %arg0, %c0_i32 : i32, i32
  }
  func.func @transform_2(%arg0: i32, %arg1: i32) -> (i32, i32, i32) {
    %c0_i32 = arith.constant 0 : i32
    %c0_i32_0 = arith.constant 0 : i32
    return %arg1, %arg0, %c0_i32 : i32, i32, i32
  }
}

</mosaic_0001>

<bundles_post_ra>
// kernel: tpu_custom_call.1
= control target key start
LH: loop header
LB: loop body
LE: loop exit
PB: predicated region body
PF: predicated region fallthrough
CT: control target
= control target key end

     0   :  { %7 = vsyncpa [#allocation3], 0  ;;  %s158_s0 = inlined_call_operand.hbm [shape: f32[2,1,256], index: 0, kind: input, shape index: {}]   ;;  %s159_s1 = inlined_call_operand.vmem [shape: f32[1,256], index: 1, kind: input, shape index: {}]   ;;  %s160_s2 = inlined_call_operand.hbm [shape: f32[2,1,256], index: 2, kind: output, shape index: {}]  }
   0x1   :  { %8 = vsyncpa [#allocation4], 0  ;;  %s106_s9 = smov [#allocation2]   ;;  %s58_s13 = scalar_lea.hbm %s158_s0, 64 }
   0x2   :  { %s14_s10 = sshll.u32 %s106_s9, 4  ;;  %p59_p0 = scmp.ne.s32.totalorder %s158_s0, %s58_s13  ;;  %s15_s10 = int_to_ptr.vmem [resolvable:$true] %s14_s10 }
   0x3   :  { %p62_p1 = scmp.lt.u32.totalorder %s58_s13, %s158_s0 }
   0x5   :  { %p64_p2 = pnand %p62_p1, %p59_p0 }
   0x7   :  { %67 = shalt.err (!%p64_p2)
}
   0x8   :  { %s68_s18 = scalar_lea.vmem %s15_s10, 64  ;;  %p73_p4 = scmp.lt.s32.totalorder %s15_s10, %s15_s10 }
   0x9   :  { %p69_p3 = scmp.ne.s32.totalorder %s15_s10, %s68_s18  ;;  %p74_p5 = scmp.lt.s32.totalorder %s68_s18, %s68_s18 }
   0xb   :  { %p75_p6 = por %p74_p5, %p73_p4 }
   0xd   :  { %p76_p7 = pnand %p75_p6, %p69_p3 }
   0xf   :  { %79 = shalt.err (!%p76_p7)
}
  0x10   :  { %s107_s19 = smov 32   ;;  %s108_s20 = smov 2  }
  0x11   :  { %20 = dma.hbm_to_vmem [thread:$0]  %s158_s0, 64, %s15_s10, [#allocation3], %s107_s19, %s107_s19, %s108_s20  }
  0x12   :  { %102 = dma.done.wait [#allocation3], 64  }
  0x13   :  { %103 = vsyncadd [#allocation3], 4294967232  ;;  %v31_v0 = vlaneseq  ;;  %s109_s23 = smov [#allocation5]   ;;  %v26_v1 = vld [vmem:[#allocation2] sm:$0x3] }
  0x14   :  { %s42_s24 = sshll.u32 %s109_s23, 4  ;;  %v28_v2 = vld [vmem:[%s159_s1] sm:$0x3]  ;;  %v27_v3 = vld [vmem:[#allocation2 + $0x2] sm:$0x3]  ;;  %s43_s24 = int_to_ptr.vmem [resolvable:$true] %s42_s24 }
  0x15   :  { %vm33_vm0 = vcmp.lt.s32.totalorder %v31_v0, 256  ;;  %v29_v4 = vadd.f32 %v28_v2, %v26_v1  ;;  %v30_v5 = vadd.f32 %v28_v2, %v27_v3  ;;  %s80_s27 = scalar_lea.vmem %s43_s24, 64  ;;  %p85_p9 = scmp.lt.s32.totalorder %s43_s24, %s43_s24 }
  0x16   :  { %p81_p8 = scmp.ne.s32.totalorder %s43_s24, %s80_s27  ;;  %p86_p10 = scmp.lt.s32.totalorder %s80_s27, %s80_s27 }
  0x17   :  { %35 = vst.msk [vmem:[#allocation5] sm:$0x3] %vm33_vm0, %v29_v4  ;;  %36 = vst.msk [vmem:[#allocation5 + $0x2] sm:$0x3] %vm33_vm0, %v30_v5 }
  0x18   :  { %p87_p11 = por %p86_p10, %p85_p9 }
  0x1a   :  { %p88_p12 = pnand %p87_p11, %p81_p8 }
  0x1c   :  { %91 = shalt.err (!%p88_p12)
}
  0x1d   :  { %s92_s29 = scalar_lea.hbm %s160_s2, 64 }
  0x1e   :  { %p93_p13 = scmp.ne.s32.totalorder %s160_s2, %s92_s29  ;;  %p96_p0 = scmp.lt.u32.totalorder %s92_s29, %s160_s2 }
  0x20   :  { %p98_p1 = pnand %p96_p0, %p93_p13 }
  0x22   :  { %101 = shalt.err (!%p98_p1)
}
  0x23   :  { %48 = dma.vmem_to_hbm [thread:$0]  %s43_s24, 64, %s160_s2, [#allocation4], %s107_s19, %s107_s19, %s108_s20  }
  0x24   :  { %104 = dma.done.wait [#allocation4], 64  }
  0x25   :  { %105 = vsyncadd [#allocation4], 4294967232 }
  0x26   :  { %52 = vsyncpa [#allocation3], 1 }
  0x27   :  { %53 = vsyncpa [#allocation4], 1 }

</bundles_post_ra>
